<compile_context>
chip_gen: v7x
topology: tpu7x:2x2x1
jax: 0.10.0
libtpu: 0.0.40
codegen_flags: <defaults>
</compile_context>

<pallas_src>
import jax
import jax.numpy as jnp
from jax.experimental import pallas as pl
from jax.experimental.pallas import tpu as pltpu


def _round_up(a: int, b: int) -> int:
    return (a + b - 1) // b * b


def _round_down(a: int, b: int) -> int:
    return (a // b) * b


def _mm_kernel_accumulate_out(x_ref, w_ref, o_ref):
    """Output dtype == f32: accumulate directly into the resident output block."""
    @pl.when(pl.program_id(2) == 0)
    def _():
        o_ref[...] = jnp.zeros_like(o_ref)

    o_ref[...] += jnp.dot(
        x_ref[...], w_ref[...], preferred_element_type=jnp.float32
    )


def _mm_kernel_scratch_acc(x_ref, w_ref, o_ref, acc_ref):
    """Non-f32 output: f32 scratch accumulator, cast once on the last K step."""
    @pl.when(pl.program_id(2) == 0)
    def _():
        acc_ref[...] = jnp.zeros_like(acc_ref)

    acc_ref[...] += jnp.dot(
        x_ref[...], w_ref[...], preferred_element_type=jnp.float32
    )

    @pl.when(pl.program_id(2) == pl.num_programs(2) - 1)
    def _():
        o_ref[...] = acc_ref[...].astype(o_ref.dtype)


def transpose_linear(
    x: jax.Array,
    weights: jax.Array,
    *,
    tm: int | None = None,
    tn: int | None = None,
    tk: int | None = None,
    compute_dtype=None,
    vmem_budget_bytes: int = 40 * 1024 * 1024,
) -> jax.Array:
    """Pallas equivalent of TransposeLinear.forward: x @ weights."""
    M, K = x.shape
    K2, N = weights.shape
    if K != K2:
        raise ValueError(f"inner dims must match, got {K} vs {K2}")

    # torch.mm output dtype semantics (same-dtype operands in practice).
    out_dtype = jnp.result_type(x.dtype, weights.dtype)

    # Optional lower-precision compute path (f32 accumulation is kept).
    if compute_dtype is not None:
        x = x.astype(compute_dtype)
        weights = weights.astype(compute_dtype)

    x_bytes = jnp.dtype(x.dtype).itemsize
    w_bytes = jnp.dtype(weights.dtype).itemsize
    o_bytes = jnp.dtype(out_dtype).itemsize

    # Sublane granularity for the second-to-last dim (f32: 8, bf16: 16, ...).
    sub = max(32 // x_bytes, 32 // o_bytes, 8)

    # Minimum padded extents (lane-dense output, aligned sublanes).
    m_align = _round_up(M, sub)
    k_align = _round_up(K, 128)
    n_align = _round_up(N, 128)

    # --- tile selection: start big, shrink to the VMEM budget ----------------
    if tm is None:
        tm = min(m_align, 256)
    if tn is None:
        tn = min(n_align, 512)
    if tk is None:
        tk = min(k_align, 1024)
    tm = min(_round_up(tm, sub), m_align)
    tn = min(_round_up(tn, 128), n_align)
    tk = min(_round_up(tk, 128), k_align)

    # Megacore (v7x): if M collapses to a single block, split N across cores.
    if m_align <= tm and n_align // tn < 2 and n_align >= 256:
        tn = max(128, _round_up(n_align // 2, 128))

    def vmem_needed(tm_, tn_, tk_):
        # double-buffered inputs + double-buffered output + worst-case scratch
        return (
            2 * (tm_ * tk_ * x_bytes + tk_ * tn_ * w_bytes)
            + 2 * tm_ * tn_ * o_bytes
            + tm_ * tn_ * 4
        )

    while vmem_needed(tm, tn, tk) > vmem_budget_bytes and tk > 128:
        tk = max(128, _round_down(tk // 2, 128))
    while vmem_needed(tm, tn, tk) > vmem_budget_bytes and tn > 128:
        tn = max(128, _round_down(tn // 2, 128))
    while vmem_needed(tm, tn, tk) > vmem_budget_bytes and tm > sub:
        tm = max(sub, _round_down(tm // 2, sub))

    # --- pad operands so tiles divide the (padded) problem --------------------
    Mp = _round_up(M, tm)
    Kp = _round_up(K, tk)
    Np = _round_up(N, tn)
    if (Mp, Kp) != (M, K):
        x = jnp.pad(x, ((0, Mp - M), (0, Kp - K)))
    if (Kp, Np) != (K, N):
        weights = jnp.pad(weights, ((0, Kp - K), (0, Np - N)))

    grid = (Mp // tm, Np // tn, Kp // tk)

    # --- kernel / scratch selection -------------------------------------------
    if out_dtype == jnp.float32:
        kernel = _mm_kernel_accumulate_out
        scratch_shapes = []
    else:
        kernel = _mm_kernel_scratch_acc
        scratch_shapes = [pltpu.VMEM((tm, tn), jnp.float32)]

    vmem_limit = int(
        min(64 * 1024 * 1024, max(vmem_needed(tm, tn, tk) + (8 << 20), 32 << 20))
    )

    cost = pl.CostEstimate(
        flops=2 * M * N * K,
        transcendentals=0,
        bytes_accessed=x_bytes * M * K + w_bytes * K * N + o_bytes * M * N,
    )

    out = pl.pallas_call(
        kernel,
        out_shape=jax.ShapeDtypeStruct((Mp, Np), out_dtype),
        grid_spec=pltpu.PrefetchScalarGridSpec(
            num_scalar_prefetch=0,
            grid=grid,
            in_specs=[
                pl.BlockSpec((tm, tk), lambda i, j, k: (i, k)),
                pl.BlockSpec((tk, tn), lambda i, j, k: (k, j)),
            ],
            out_specs=pl.BlockSpec((tm, tn), lambda i, j, k: (i, j)),
            scratch_shapes=scratch_shapes,
        ),
        compiler_params=pltpu.CompilerParams(
            dimension_semantics=("parallel", "parallel", "arbitrary"),
            vmem_limit_bytes=vmem_limit,
        ),
        cost_estimate=cost,
    )(x, weights)

    if (Mp, Np) != (M, N):
        out = out[:M, :N]
    return out


if __name__ == "__main__":
    key = jax.random.PRNGKey(0)
    kx, kw, kx2, kw2 = jax.random.split(key, 4)

    # Shapes consistent with NBEATS head usage:
    #   x: [batch, in_features], weights: [in_features, out_features]
    M, K, N = 64, 256, 128
    x = jax.random.normal(kx, (M, K), dtype=jnp.float32)
    weights = jax.random.normal(kw, (K, N), dtype=jnp.float32)

    out = transpose_linear(x, weights)
    out = jax.block_until_ready(out)

    ref = x @ weights
    assert out.shape == (M, N)
    assert jnp.allclose(out, ref, atol=1e-4, rtol=1e-4)

    # Ragged (non-tile-aligned) shape exercises the padding path that replaced
    # the old hard divisibility asserts.
    M2, K2, N2 = 10, 50, 33
    x2 = jax.random.normal(kx2, (M2, K2), dtype=jnp.float32)
    w2 = jax.random.normal(kw2, (K2, N2), dtype=jnp.float32)
    out2 = jax.block_until_ready(transpose_linear(x2, w2))
    assert out2.shape == (M2, N2)
    assert jnp.allclose(out2, x2 @ w2, atol=1e-4, rtol=1e-4)

    print("KERNEL_OK")
</pallas_src>

<mosaic_0001>
module attributes {stable_mosaic.version = 11 : i64} {
  func.func @_mm_kernel_accumulate_out(%arg0: i32, %arg1: i32, %arg2: i32, %arg3: memref<64x256xf32, #tpu.memory_space<vmem>>, %arg4: memref<256x128xf32, #tpu.memory_space<vmem>>, %arg5: memref<64x128xf32, #tpu.memory_space<vmem>>) attributes {dimension_semantics = [#tpu.dimension_semantics<parallel>, #tpu.dimension_semantics<parallel>, #tpu.dimension_semantics<arbitrary>], iteration_bounds = array<i64: 1, 1, 1>, scalar_prefetch = 0 : i64, scratch_operands = 0 : i64, tpu.core_type = #tpu.core_type<tc>, window_params = [{transform_indices = @transform_0, window_bounds = array<i64: 64, 256>}, {transform_indices = @transform_1, window_bounds = array<i64: 256, 128>}, {transform_indices = @transform_2, window_bounds = array<i64: 64, 128>}]} {
    %c0_i32 = arith.constant 0 : i32
    %0 = arith.cmpi eq, %arg2, %c0_i32 : i32
    %1 = arith.extui %0 : i1 to i32
    %c0_i32_0 = arith.constant 0 : i32
    %2 = arith.cmpi ne, %1, %c0_i32_0 : i32
    scf.if %2 {
      %cst_8 = arith.constant 0.000000e+00 : f32
      %9 = vector.broadcast %cst_8 : f32 to vector<64x128xf32>
      %c0_9 = arith.constant 0 : index
      %c0_10 = arith.constant 0 : index
      %10 = vector.load %arg5[%c0_9, %c0_10] : memref<64x128xf32, #tpu.memory_space<vmem>>, vector<64x128xf32>
      tpu.vector_store %arg5[%c0_9, %c0_10], %9 {strides = array<i32>} : memref<64x128xf32, #tpu.memory_space<vmem>>, vector<64x128xf32>,
    } else {
    }
    %c0 = arith.constant 0 : index
    %c0_1 = arith.constant 0 : index
    %3 = vector.load %arg5[%c0, %c0_1] : memref<64x128xf32, #tpu.memory_space<vmem>>, vector<64x128xf32>
    %c0_2 = arith.constant 0 : index
    %c0_3 = arith.constant 0 : index
    %4 = vector.load %arg3[%c0_2, %c0_3] : memref<64x256xf32, #tpu.memory_space<vmem>>, vector<64x256xf32>
    %c0_4 = arith.constant 0 : index
    %c0_5 = arith.constant 0 : index
    %5 = vector.load %arg4[%c0_4, %c0_5] : memref<256x128xf32, #tpu.memory_space<vmem>>, vector<256x128xf32>
    %cst = arith.constant dense<0.000000e+00> : vector<64x128xf32>
    %6 = tpu.matmul %4, %5, %cst {dimension_numbers = #tpu.dot_dimension_numbers<[1], [0], [0], [1], [0, 0, 1, 1], [], []>} : vector<64x256xf32>, vector<256x128xf32>, vector<64x128xf32> -> vector<64x128xf32>
    %7 = arith.addf %3, %6 : vector<64x128xf32>
    %c0_6 = arith.constant 0 : index
    %c0_7 = arith.constant 0 : index
    %8 = vector.load %arg5[%c0_6, %c0_7] : memref<64x128xf32, #tpu.memory_space<vmem>>, vector<64x128xf32>
    tpu.vector_store %arg5[%c0_6, %c0_7], %7 {strides = array<i32>} : memref<64x128xf32, #tpu.memory_space<vmem>>, vector<64x128xf32>,
    return
  }
  func.func @transform_0(%arg0: i32, %arg1: i32, %arg2: i32) -> (i32, i32) {
    %c0_i32 = arith.constant 0 : i32
    return %arg0, %arg2 : i32, i32
  }
  func.func @transform_1(%arg0: i32, %arg1: i32, %arg2: i32) -> (i32, i32) {
    %c0_i32 = arith.constant 0 : i32
    return %arg2, %arg1 : i32, i32
  }
  func.func @transform_2(%arg0: i32, %arg1: i32, %arg2: i32) -> (i32, i32) {
    %c0_i32 = arith.constant 0 : i32
    return %arg0, %arg1 : i32, i32
  }
}

</mosaic_0001>

<bundles_post_ra>
// kernel: tpu_custom_call.1
= control target key start
LH: loop header
LB: loop body
LE: loop exit
PB: predicated region body
PF: predicated region fallthrough
CT: control target
= control target key end

     0   :  { %7 = vsyncpa [#allocation3], 0  ;;  %s495_s0 = inlined_call_operand.hbm [shape: f32[64,256], index: 0, kind: input, shape index: {}]   ;;  %s496_s1 = inlined_call_operand.hbm [shape: f32[256,128], index: 1, kind: input, shape index: {}]   ;;  %s497_s2 = inlined_call_operand.hbm [shape: f32[64,128], index: 2, kind: output, shape index: {}]  }
   0x1   :  { %8 = vsyncpa [#allocation6], 0 }
   0x2   :  { %9 = vsyncpa [#allocation4], 0  ;;  %s431_s9 = smov [#allocation2]   ;;  %s359_s13 = scalar_lea.hbm %s495_s0, 2048 }
   0x3   :  { %s15_s10 = sshll.u32 %s431_s9, 4  ;;  %p360_p0 = scmp.ne.s32.totalorder %s495_s0, %s359_s13  ;;  %s16_s10 = int_to_ptr.vmem [resolvable:$true] %s15_s10 }
   0x4   :  { %p363_p1 = scmp.lt.u32.totalorder %s359_s13, %s495_s0 }
   0x6   :  { %p365_p2 = pnand %p363_p1, %p360_p0 }
   0x8   :  { %368 = shalt.err (!%p365_p2)
}
   0x9   :  { %s369_s18 = scalar_lea.vmem %s16_s10, 2048  ;;  %p374_p4 = scmp.lt.s32.totalorder %s16_s10, %s16_s10 }
   0xa   :  { %p370_p3 = scmp.ne.s32.totalorder %s16_s10, %s369_s18  ;;  %p375_p5 = scmp.lt.s32.totalorder %s369_s18, %s369_s18 }
   0xc   :  { %p376_p6 = por %p375_p5, %p374_p4 }
   0xe   :  { %p377_p7 = pnand %p376_p6, %p370_p3 }
  0x10   :  { %380 = shalt.err (!%p377_p7)
}
  0x11   :  { %s432_s19 = smov 256   ;;  %s433_s20 = smov 16  }
  0x12   :  { %21 = dma.hbm_to_vmem [thread:$0]  %s495_s0, 2048, %s16_s10, [#allocation3], %s432_s19, %s432_s19, %s433_s20  }
  0x13   :  { %s434_s23 = smov [#allocation5]   ;;  %s381_s27 = scalar_lea.hbm %s496_s1, 4096 }
  0x14   :  { %s27_s24 = sshll.u32 %s434_s23, 4  ;;  %p382_p8 = scmp.ne.s32.totalorder %s496_s1, %s381_s27  ;;  %s28_s24 = int_to_ptr.vmem [resolvable:$true] %s27_s24 }
  0x15   :  { %p385_p9 = scmp.lt.u32.totalorder %s381_s27, %s496_s1 }
  0x17   :  { %p387_p10 = pnand %p385_p9, %p382_p8 }
  0x19   :  { %390 = shalt.err (!%p387_p10)
}
  0x1a   :  { %s391_s4 = scalar_lea.vmem %s28_s24, 4096  ;;  %p396_p12 = scmp.lt.s32.totalorder %s28_s24, %s28_s24 }
  0x1b   :  { %p392_p11 = scmp.ne.s32.totalorder %s28_s24, %s391_s4  ;;  %p397_p13 = scmp.lt.s32.totalorder %s391_s4, %s391_s4 }
  0x1d   :  { %p398_p0 = por %p397_p13, %p396_p12 }
  0x1f   :  { %p399_p1 = pnand %p398_p0, %p392_p11 }
  0x21   :  { %402 = shalt.err (!%p399_p1)
}
  0x22   :  { %s435_s0 = smov 128   ;;  %s436_s5 = smov 8  }
  0x23   :  { %33 = dma.hbm_to_vmem [thread:$0]  %s496_s1, 4096, %s28_s24, [#allocation6], %s435_s0, %s435_s0, %s436_s5  }
  0x24   :  { %425 = dma.done.wait [#allocation3], 2048  }
  0x25   :  { %426 = vsyncadd [#allocation3], 4294965248 }
  0x26   :  { %427 = dma.done.wait [#allocation6], 4096  }
  0x27   :  { %428 = vsyncadd [#allocation6], 4294963200  ;;  %v92_v0 = vld [vmem:[#allocation5 + $0x80] sm:$0xff]  ;;  %v93_v1 = vld [vmem:[#allocation5 + $0x88] sm:$0xff]  ;;  %s437_s1 = smov [#allocation7]  }
  0x28   :  { %v76_v2 = vld [vmem:[#allocation5] sm:$0xff]  ;;  %v303_v3 = vpack.c.bf16 %v93_v1, %v92_v0  ;;  %v77_v4 = vld [vmem:[#allocation5 + $0x8] sm:$0xff]  ;;  %v94_v5 = vld [vmem:[#allocation5 + $0x90] sm:$0xff]  ;;  %s234_s8 = sshll.u32 %s437_s1, 4  ;;  %s235_s8 = int_to_ptr.vmem [resolvable:$true] %s234_s8 }
  0x29   :  { %v95_v6 = vld [vmem:[#allocation5 + $0x98] sm:$0xff]  ;;  %v305_v7 = vpack.c.bf16 %v77_v4, %v76_v2  ;;  %v78_v9 = vld [vmem:[#allocation5 + $0x10] sm:$0xff]  ;;  %v96_v11 = vld [vmem:[#allocation5 + $0xa0] sm:$0xff]  ;;  %s403_s9 = scalar_lea.vmem %s235_s8, 1024  ;;  %p408_p3 = scmp.lt.s32.totalorder %s235_s8, %s235_s8 }
  0x2a   :  { %v307_v8 = vpack.c.bf16 %v95_v6, %v94_v5  ;;  %v79_v10 = vld [vmem:[#allocation5 + $0x18] sm:$0xff]  ;;  %304 = vmatprep.subr.bf16.mxu0 %v303_v3  ;;  %335 = vmatprep.subr.bf16.mxu1 %v303_v3  ;;  %v97_v12 = vld [vmem:[#allocation5 + $0xa8] sm:$0xff]  ;;  %v80_v15 = vld [vmem:[#allocation5 + $0x20] sm:$0xff]  ;;  %p404_p2 = scmp.ne.s32.totalorder %s235_s8, %s403_s9  ;;  %p409_p4 = scmp.lt.s32.totalorder %s403_s9, %s403_s9 }
  0x2b   :  { %306 = vmatpush3.bf16.msra.mxu0 %v305_v7  ;;  %343 = vmatpush3.bf16.msra.mxu1 %v305_v7  ;;  %v309_v13 = vpack.c.bf16 %v79_v10, %v78_v9  ;;  %v311_v14 = vpack.c.bf16 %v97_v12, %v96_v11  ;;  %v81_v16 = vld [vmem:[#allocation5 + $0x28] sm:$0xff]  ;;  %v98_v17 = vld [vmem:[#allocation5 + $0xb0] sm:$0xff]  ;;  %v99_v18 = vld [vmem:[#allocation5 + $0xb8] sm:$0xff] }
  0x2c   :  { %308 = vmatprep.subr.bf16.mxu0 %v307_v8  ;;  %336 = vmatprep.subr.bf16.mxu1 %v307_v8  ;;  %v313_v19 = vpack.c.bf16 %v81_v16, %v80_v15  ;;  %v315_v20 = vpack.c.bf16 %v99_v18, %v98_v17  ;;  %v82_v21 = vld [vmem:[#allocation5 + $0x30] sm:$0xff]  ;;  %v83_v22 = vld [vmem:[#allocation5 + $0x38] sm:$0xff]  ;;  %v100_v23 = vld [vmem:[#allocation5 + $0xc0] sm:$0xff]  ;;  %p410_p5 = por %p409_p4, %p408_p3 }
  0x2d   :  { %v101_v24 = vld [vmem:[#allocation5 + $0xc8] sm:$0xff]  ;;  %v317_v27 = vpack.c.bf16 %v83_v22, %v82_v21  ;;  %v84_v29 = vld [vmem:[#allocation5 + $0x40] sm:$0xff]  ;;  %v102_v31 = vld [vmem:[#allocation5 + $0xd0] sm:$0xff] }
  0x2e   :  { %v61_v25 = vld [vmem:[#allocation2 + $0x8] sm:$0xff]  ;;  %v319_v28 = vpack.c.bf16 %v101_v24, %v100_v23  ;;  %v103_v32 = vld [vmem:[#allocation5 + $0xd8] sm:$0xff]  ;;  %v86_v35 = vld [vmem:[#allocation5 + $0x50] sm:$0xff]  ;;  %p411_p6 = pnand %p410_p5, %p404_p2 }
  0x2f   :  { %310 = vmatpush3.bf16.msra.mxu0 %v309_v13  ;;  %344 = vmatpush3.bf16.msra.mxu1 %v309_v13  ;;  %v69_v26 = vld [vmem:[#allocation2 + $0x48] sm:$0xff]  ;;  %v323_v34 = vpack.c.bf16 %v103_v32, %v102_v31  ;;  %v87_v36 = vld [vmem:[#allocation5 + $0x58] sm:$0xff]  ;;  %v104_v37 = vld [vmem:[#allocation5 + $0xe0] sm:$0xff] }
  0x30   :  { %312 = vmatprep.subr.bf16.mxu0 %v311_v14  ;;  %337 = vmatprep.subr.bf16.mxu1 %v311_v14  ;;  %v85_v30 = vld [vmem:[#allocation5 + $0x48] sm:$0xff]  ;;  %v325_v39 = vpack.c.bf16 %v87_v36, %v86_v35  ;;  %v88_v41 = vld [vmem:[#allocation5 + $0x60] sm:$0xff]  ;;  %v106_v43 = vld [vmem:[#allocation5 + $0xf0] sm:$0xff] }
  0x31   :  { %172 = vmatprep.mubr.f32.mxu0 %v61_v25  ;;  %192 = vmatprep.mubr.f32.mxu1 %v69_v26  ;;  %v321_v33 = vpack.c.bf16 %v85_v30, %v84_v29  ;;  %v105_v38 = vld [vmem:[#allocation5 + $0xe8] sm:$0xff]  ;;  %v107_v44 = vld [vmem:[#allocation5 + $0xf8] sm:$0xff]  ;;  %v90_v47 = vld [vmem:[#allocation5 + $0x70] sm:$0xff] }
  0x32   :  { %v327_v40 = vpack.c.bf16 %v105_v38, %v104_v37  ;;  %v89_v42 = vld [vmem:[#allocation5 + $0x68] sm:$0xff]  ;;  %v331_v46 = vpack.c.bf16 %v107_v44, %v106_v43  ;;  %v91_v48 = vld [vmem:[#allocation5 + $0x78] sm:$0xff]  ;;  %v60_v50 = vld [vmem:[#allocation2] sm:$0xff] }
  0x33   :  { %314 = vmatpush3.bf16.msra.mxu0 %v313_v19  ;;  %345 = vmatpush3.bf16.msra.mxu1 %v313_v19  ;;  %v329_v45 = vpack.c.bf16 %v89_v42, %v88_v41  ;;  %v333_v49 = vpack.c.bf16 %v91_v48, %v90_v47  ;;  %v68_v51 = vld [vmem:[#allocation2 + $0x40] sm:$0xff]  ;;  %v63_v52 = vld [vmem:[#allocation2 + $0x18] sm:$0xff]  ;;  %v62_v54 = vld [vmem:[#allocation2 + $0x10] sm:$0xff] }
  0x34   :  { %316 = vmatprep.subr.bf16.mxu0 %v315_v20  ;;  %338 = vmatprep.subr.bf16.mxu1 %v315_v20  ;;  %v71_v53 = vld [vmem:[#allocation2 + $0x58] sm:$0xff]  ;;  %v70_v55 = vld [vmem:[#allocation2 + $0x50] sm:$0xff]  ;;  %v65_v56 = vld [vmem:[#allocation2 + $0x28] sm:$0xff] }
  0x35   :  { %v73_v57 = vld [vmem:[#allocation2 + $0x68] sm:$0xff]  ;;  %v64_v58 = vld [vmem:[#allocation2 + $0x20] sm:$0xff]  ;;  %v67_v60 = vld [vmem:[#allocation2 + $0x38] sm:$0xff] }
  0x36   :  { %v72_v59 = vld [vmem:[#allocation2 + $0x60] sm:$0xff]  ;;  %v75_v61 = vld [vmem:[#allocation2 + $0x78] sm:$0xff]  ;;  %v66_v62 = vld [vmem:[#allocation2 + $0x30] sm:$0xff] }
  0x37   :  { %318 = vmatpush3.bf16.msra.mxu0 %v317_v27  ;;  %346 = vmatpush3.bf16.msra.mxu1 %v317_v27  ;;  %v74_v63 = vld [vmem:[#allocation2 + $0x70] sm:$0xff] }
  0x38   :  { %320 = vmatprep.subr.bf16.mxu0 %v319_v28  ;;  %339 = vmatprep.subr.bf16.mxu1 %v319_v28 }
  0x3b   :  { %322 = vmatpush3.bf16.msra.mxu0 %v321_v33  ;;  %347 = vmatpush3.bf16.msra.mxu1 %v321_v33 }
  0x3c   :  { %324 = vmatprep.subr.bf16.mxu0 %v323_v34  ;;  %340 = vmatprep.subr.bf16.mxu1 %v323_v34 }
  0x3f   :  { %326 = vmatpush3.bf16.msra.mxu0 %v325_v39  ;;  %348 = vmatpush3.bf16.msra.mxu1 %v325_v39 }
  0x40   :  { %328 = vmatprep.subr.bf16.mxu0 %v327_v40  ;;  %341 = vmatprep.subr.bf16.mxu1 %v327_v40 }
  0x43   :  { %330 = vmatpush3.bf16.msra.mxu0 %v329_v45  ;;  %349 = vmatpush3.bf16.msra.mxu1 %v329_v45 }
  0x44   :  { %332 = vmatprep.subr.bf16.mxu0 %v331_v46  ;;  %342 = vmatprep.subr.bf16.mxu1 %v331_v46 }
  0x47   :  { %334 = vmatpush3.bf16.msra.mxu0 %v333_v49  ;;  %350 = vmatpush3.bf16.msra.mxu1 %v333_v49 }
  0x4a   :  { %173 = vmatmul.mubr.f32.vlgmr.msra.gmra.mrb[0].mxu0 %v60_v50  ;;  %193 = vmatmul.mubr.f32.vlgmr.msra.gmra.mrb[0].mxu1 %v68_v51 }
  0x4b   :  { %177 = vmatprep.mubr.f32.mxu0 %v63_v52  ;;  %197 = vmatprep.mubr.f32.mxu1 %v71_v53 }
  0x4e   :  { %178 = vmatmul.mubr.f32.gmra.mrb[2].mxu0 %v62_v54  ;;  %198 = vmatmul.mubr.f32.gmra.mrb[2].mxu1 %v70_v55 }
  0x4f   :  { %182 = vmatprep.mubr.f32.mxu0 %v65_v56  ;;  %202 = vmatprep.mubr.f32.mxu1 %v73_v57 }
  0x52   :  { %183 = vmatmul.mubr.f32.gmra.mrb[4].mxu0 %v64_v58  ;;  %203 = vmatmul.mubr.f32.gmra.mrb[4].mxu1 %v72_v59 }
  0x53   :  { %187 = vmatprep.mubr.f32.mxu0 %v67_v60  ;;  %207 = vmatprep.mubr.f32.mxu1 %v75_v61 }
  0x56   :  { %188 = vmatmul.mubr.f32.gmra.mrb[6].mxu0 %v66_v62  ;;  %208 = vmatmul.mubr.f32.gmra.mrb[6].mxu1 %v74_v63 }
 0x11d   :  { %v279_v0 = vpop.f32.mrb[0].mxu0  ;;  %v291_v1 = vpop.f32.mrb[0].mxu1 }
 0x11e   :  { %v280_v2 = vpop.f32.mrb[1].mxu0  ;;  %v292_v3 = vpop.f32.mrb[1].mxu1 }
 0x11f   :  { %v281_v4 = vadd.f32 %v280_v2, %v279_v0  ;;  %v293_v5 = vadd.f32 %v292_v3, %v291_v1 }
 0x121   :  { %v282_v6 = vpop.f32.mrb[2].mxu0  ;;  %v294_v7 = vpop.f32.mrb[2].mxu1  ;;  %221 = vst [vmem:[#allocation7] sm:$0xff] %v281_v4  ;;  %225 = vst [vmem:[#allocation7 + $0x20] sm:$0xff] %v293_v5 }
 0x122   :  { %v283_v8 = vpop.f32.mrb[3].mxu0  ;;  %v295_v9 = vpop.f32.mrb[3].mxu1 }
 0x123   :  { %v284_v10 = vadd.f32 %v283_v8, %v282_v6  ;;  %v296_v11 = vadd.f32 %v295_v9, %v294_v7 }
 0x125   :  { %v285_v12 = vpop.f32.mrb[4].mxu0  ;;  %v297_v13 = vpop.f32.mrb[4].mxu1  ;;  %222 = vst [vmem:[#allocation7 + $0x8] sm:$0xff] %v284_v10  ;;  %226 = vst [vmem:[#allocation7 + $0x28] sm:$0xff] %v296_v11 }
 0x126   :  { %v286_v14 = vpop.f32.mrb[5].mxu0  ;;  %v298_v15 = vpop.f32.mrb[5].mxu1 }
 0x127   :  { %v287_v16 = vadd.f32 %v286_v14, %v285_v12  ;;  %v299_v17 = vadd.f32 %v298_v15, %v297_v13 }
 0x129   :  { %v288_v18 = vpop.f32.mrb[6].mxu0  ;;  %v300_v19 = vpop.f32.mrb[6].mxu1  ;;  %223 = vst [vmem:[#allocation7 + $0x10] sm:$0xff] %v287_v16  ;;  %227 = vst [vmem:[#allocation7 + $0x30] sm:$0xff] %v299_v17 }
 0x12a   :  { %v289_v20 = vpop.f32.mrb[7].mxu0  ;;  %v301_v21 = vpop.f32.mrb[7].mxu1 }
 0x12b   :  { %v290_v22 = vadd.f32 %v289_v20, %v288_v18  ;;  %v302_v23 = vadd.f32 %v301_v21, %v300_v19 }
 0x12d   :  { %224 = vst [vmem:[#allocation7 + $0x18] sm:$0xff] %v290_v22  ;;  %228 = vst [vmem:[#allocation7 + $0x38] sm:$0xff] %v302_v23 }
 0x12e   :  { %414 = shalt.err (!%p411_p6)
}
 0x12f   :  { %s415_s12 = scalar_lea.hbm %s497_s2, 1024 }
 0x130   :  { %p416_p7 = scmp.ne.s32.totalorder %s497_s2, %s415_s12  ;;  %p419_p8 = scmp.lt.u32.totalorder %s415_s12, %s497_s2 }
 0x132   :  { %p421_p9 = pnand %p419_p8, %p416_p7 }
 0x134   :  { %424 = shalt.err (!%p421_p9)
}
 0x135   :  { %240 = dma.vmem_to_hbm [thread:$0]  %s235_s8, 1024, %s497_s2, [#allocation4], %s435_s0, %s435_s0, %s436_s5  }
 0x136   :  { %429 = dma.done.wait [#allocation4], 1024  }
 0x137   :  { %430 = vsyncadd [#allocation4], 4294966272 }
 0x138   :  { %244 = vsyncpa [#allocation3], 1 }
 0x139   :  { %245 = vsyncpa [#allocation6], 1 }
 0x13a   :  { %246 = vsyncpa [#allocation4], 1 }

</bundles_post_ra>
